<compile_context>
chip_gen: v7x
topology: tpu7x:2x2x1
jax: 0.10.0
libtpu: 0.0.40
codegen_flags: <defaults>
</compile_context>

<pallas_src>
import jax
import jax.numpy as jnp
import numpy as np
from jax import lax
from jax.experimental import pallas as pl
from jax.experimental.pallas import tpu as pltpu

# ---- static problem configuration (matches the synthetic module below) ----
N, C, H, W = 2, 4, 16, 16
KH = KW = 3
C_OUT = 8
NUM_CLASSES = 10

HW = H * W                       # output pixels per image (256, multiple of 8)
ROWS = N * HW                    # im2col rows (512)
K_TAPS = KH * KW * C             # real contraction depth (36)
LANES = 128                      # lane-dense padded K / channel / class dim
INV_HW = 1.0 / float(HW)


def cnn_head_kernel(lhs_ref, conv_w_ref, conv_b_ref, head_w_ref, head_b_ref,
                    out_ref):
    # --- whole conv as ONE matmul: (ROWS, 128) bf16 @ (128, 128) bf16 -> f32 ---
    conv = jnp.dot(lhs_ref[...], conv_w_ref[...],
                   preferred_element_type=jnp.float32)            # (ROWS, 128)

    # bias + ReLU in f32 (biases are lane-padded; padded channels stay 0)
    act = jnp.maximum(conv + conv_b_ref[...], 0.0)                # (ROWS, 128)

    # --- global average pool: one sublane-aligned segmented reduce per image ---
    feats = []
    for n in range(N):                                            # tiny static loop
        seg = act[n * HW:(n + 1) * HW, :]                         # aligned 256-row slice
        feats.append(jnp.sum(seg, axis=0, keepdims=True))         # (1, 128)  (XLU)
    feat = jnp.concatenate(feats, axis=0) * INV_HW                # (N, 128)

    # --- linear head on lane-padded classes ---
    logits = jnp.dot(feat.astype(jnp.bfloat16), head_w_ref[...],
                     preferred_element_type=jnp.float32) + head_b_ref[...]
    out_ref[...] = logits                                         # (N, 128), lane-dense


def prepare_params(conv_w, conv_b, head_w, head_b):
    """One-time layout prep for the frozen weights (hoisted out of the hot path)."""
    # conv_w (Cout, C, KH, KW) -> stacked im2col RHS (KH*KW*C, Cout) with row
    # index = (ky*KW + kx)*C + c (tap-major, channel-minor, matches the LHS),
    # then zero-pad K 36->128 and Cout 8->128, cast bf16.
    w = jnp.transpose(conv_w, (2, 3, 1, 0)).reshape(K_TAPS, C_OUT)
    w = jnp.pad(w, ((0, LANES - K_TAPS), (0, LANES - C_OUT))).astype(jnp.bfloat16)
    b = jnp.pad(conv_b, (0, LANES - C_OUT)).reshape(1, LANES).astype(jnp.float32)
    # head_w (classes, Cout) -> (LANES, LANES), both dims zero-padded.
    hw = jnp.pad(head_w.T, ((0, LANES - C_OUT), (0, LANES - NUM_CLASSES)))
    hw = hw.astype(jnp.bfloat16)
    hb = jnp.pad(head_b, (0, LANES - NUM_CLASSES)).reshape(1, LANES)
    hb = hb.astype(jnp.float32)
    return w, b, hw, hb


@jax.jit
def forward(x, conv_w_p, conv_b_p, head_w_p, head_b_p):
    """x: (N, C, H, W) float32 (NCHW like PyTorch). Returns (N, NUM_CLASSES)."""
    # Wrapper-side im2col (tiny: ~128 KB bf16): NCHW -> NHWC, SAME-pad, 9 shifted
    # views concatenated tap-major/channel-minor, flattened to (N*H*W, 36),
    # zero-padded to a lane-dense K=128, cast to bf16 ONCE.
    xp = jnp.pad(jnp.transpose(x, (0, 2, 3, 1)),
                 ((0, 0), (1, 1), (1, 1), (0, 0)))                 # (N, H+2, W+2, C)
    patches = jnp.concatenate(
        [xp[:, ky:ky + H, kx:kx + W, :] for ky in range(KH) for kx in range(KW)],
        axis=-1)                                                   # (N, H, W, 36)
    lhs = patches.reshape(ROWS, K_TAPS)
    lhs = jnp.pad(lhs, ((0, 0), (0, LANES - K_TAPS))).astype(jnp.bfloat16)

    # TODO(synk): when N/H/W grow, add a parallel row-tile grid axis
    # (dimension_semantics=("parallel",)) so both v7x TensorCores are used, and
    # size the row tile for v7x's 64 MiB VMEM (~half the rows v5e/v6e allow).
    out = pl.pallas_call(
        cnn_head_kernel,
        out_shape=jax.ShapeDtypeStruct((N, LANES), jnp.float32),
        grid=(1,),
        in_specs=[
            pl.BlockSpec((ROWS, LANES), lambda i: (0, 0)),
            pl.BlockSpec((LANES, LANES), lambda i: (0, 0)),
            pl.BlockSpec((1, LANES), lambda i: (0, 0)),
            pl.BlockSpec((LANES, LANES), lambda i: (0, 0)),
            pl.BlockSpec((1, LANES), lambda i: (0, 0)),
        ],
        out_specs=pl.BlockSpec((N, LANES), lambda i: (0, 0)),
        compiler_params=pltpu.CompilerParams(
            dimension_semantics=("arbitrary",)),
    )(lhs, conv_w_p, conv_b_p, head_w_p, head_b_p)
    return out[:, :NUM_CLASSES]


if __name__ == "__main__":
    key = jax.random.PRNGKey(0)
    k1, k2, k3, k4, k5 = jax.random.split(key, 5)

    # Deterministic synthetic parameters (frozen backbone conv + linear head).
    x = jax.random.normal(k1, (N, C, H, W), jnp.float32)
    conv_w = jax.random.normal(k2, (C_OUT, C, KH, KW), jnp.float32) * 0.1
    conv_b = jax.random.normal(k3, (C_OUT,), jnp.float32) * 0.1
    head_w = jax.random.normal(k4, (NUM_CLASSES, C_OUT), jnp.float32) * 0.1
    head_b = jax.random.normal(k5, (NUM_CLASSES,), jnp.float32) * 0.1

    # Frozen-weight layout transforms: done once, outside the per-call path.
    params = prepare_params(conv_w, conv_b, head_w, head_b)

    out = jax.block_until_ready(forward(x, *params))

    # Pure-JAX f32 reference of the same forward pass.
    conv_ref = lax.conv_general_dilated(
        x, conv_w, (1, 1), "SAME", dimension_numbers=("NCHW", "OIHW", "NCHW"))
    feat_ref = jnp.maximum(conv_ref + conv_b[None, :, None, None], 0.0)
    feat_ref = feat_ref.mean(axis=(2, 3))                          # (N, C_OUT)
    ref = feat_ref @ head_w.T + head_b                             # (N, classes)

    assert out.shape == (N, NUM_CLASSES)
    # bf16 MXU operands (f32 accumulation) -> slightly looser tolerance than pure f32.
    assert np.allclose(np.asarray(out), np.asarray(ref), rtol=2e-2, atol=2e-2)
    print("KERNEL_OK")
</pallas_src>

<mosaic_0001>
module attributes {stable_mosaic.version = 11 : i64} {
  func.func @cnn_head_kernel(%arg0: i32, %arg1: memref<512x128xbf16, #tpu.memory_space<vmem>>, %arg2: memref<128x128xbf16, #tpu.memory_space<vmem>>, %arg3: memref<1x128xf32, #tpu.memory_space<vmem>>, %arg4: memref<128x128xbf16, #tpu.memory_space<vmem>>, %arg5: memref<1x128xf32, #tpu.memory_space<vmem>>, %arg6: memref<2x128xf32, #tpu.memory_space<vmem>>) attributes {dimension_semantics = [#tpu.dimension_semantics<arbitrary>], iteration_bounds = array<i64: 1>, scalar_prefetch = 0 : i64, scratch_operands = 0 : i64, tpu.core_type = #tpu.core_type<tc>, window_params = [{pipeline_mode = #tpu.pipeline_mode<synchronous>, transform_indices = @transform_0, window_bounds = array<i64: 512, 128>}, {pipeline_mode = #tpu.pipeline_mode<synchronous>, transform_indices = @transform_1, window_bounds = array<i64: 128, 128>}, {pipeline_mode = #tpu.pipeline_mode<synchronous>, transform_indices = @transform_2, window_bounds = array<i64: 1, 128>}, {pipeline_mode = #tpu.pipeline_mode<synchronous>, transform_indices = @transform_3, window_bounds = array<i64: 128, 128>}, {pipeline_mode = #tpu.pipeline_mode<synchronous>, transform_indices = @transform_4, window_bounds = array<i64: 1, 128>}, {pipeline_mode = #tpu.pipeline_mode<synchronous>, transform_indices = @transform_5, window_bounds = array<i64: 2, 128>}]} {
    %c0 = arith.constant 0 : index
    %c0_0 = arith.constant 0 : index
    %0 = vector.load %arg1[%c0, %c0_0] : memref<512x128xbf16, #tpu.memory_space<vmem>>, vector<512x128xbf16>
    %c0_1 = arith.constant 0 : index
    %c0_2 = arith.constant 0 : index
    %1 = vector.load %arg2[%c0_1, %c0_2] : memref<128x128xbf16, #tpu.memory_space<vmem>>, vector<128x128xbf16>
    %cst = arith.constant dense<0.000000e+00> : vector<512x128xf32>
    %2 = tpu.matmul %0, %1, %cst {dimension_numbers = #tpu.dot_dimension_numbers<[1], [0], [0], [1], [0, 0, 1, 1], [], []>} : vector<512x128xbf16>, vector<128x128xbf16>, vector<512x128xf32> -> vector<512x128xf32>
    %c0_3 = arith.constant 0 : index
    %c0_4 = arith.constant 0 : index
    %3 = vector.load %arg3[%c0_3, %c0_4] : memref<1x128xf32, #tpu.memory_space<vmem>>, vector<1x128xf32>
    %4 = vector.broadcast %3 : vector<1x128xf32> to vector<512x128xf32>
    %5 = arith.addf %2, %4 : vector<512x128xf32>
    %cst_5 = arith.constant 0.000000e+00 : f32
    %6 = vector.broadcast %cst_5 : f32 to vector<512x128xf32>
    %7 = arith.maximumf %5, %6 : vector<512x128xf32>
    %8 = vector.extract_strided_slice %7 {offsets = [0, 0], sizes = [256, 128], strides = [1, 1]} : vector<512x128xf32> to vector<256x128xf32>
    %cst_6 = arith.constant dense<0.000000e+00> : vector<128xf32>
    %9 = vector.multi_reduction <add>, %8, %cst_6 [0] : vector<256x128xf32> to vector<128xf32>
    %10 = vector.shape_cast %9 : vector<128xf32> to vector<1x128xf32>
    %11 = vector.extract_strided_slice %7 {offsets = [256, 0], sizes = [256, 128], strides = [1, 1]} : vector<512x128xf32> to vector<256x128xf32>
    %cst_7 = arith.constant dense<0.000000e+00> : vector<128xf32>
    %12 = vector.multi_reduction <add>, %11, %cst_7 [0] : vector<256x128xf32> to vector<128xf32>
    %13 = vector.shape_cast %12 : vector<128xf32> to vector<1x128xf32>
    %14 = tpu.concatenate %10, %13 in 0 : vector<1x128xf32>, vector<1x128xf32> -> vector<2x128xf32>
    %cst_8 = arith.constant 3.906250e-03 : f32
    %15 = vector.broadcast %cst_8 : f32 to vector<2x128xf32>
    %16 = arith.mulf %14, %15 : vector<2x128xf32>
    %17 = arith.truncf %16 : vector<2x128xf32> to vector<2x128xbf16>
    %c0_9 = arith.constant 0 : index
    %c0_10 = arith.constant 0 : index
    %18 = vector.load %arg4[%c0_9, %c0_10] : memref<128x128xbf16, #tpu.memory_space<vmem>>, vector<128x128xbf16>
    %cst_11 = arith.constant dense<0.000000e+00> : vector<2x128xf32>
    %19 = tpu.matmul %17, %18, %cst_11 {dimension_numbers = #tpu.dot_dimension_numbers<[1], [0], [0], [1], [0, 0, 1, 1], [], []>} : vector<2x128xbf16>, vector<128x128xbf16>, vector<2x128xf32> -> vector<2x128xf32>
    %c0_12 = arith.constant 0 : index
    %c0_13 = arith.constant 0 : index
    %20 = vector.load %arg5[%c0_12, %c0_13] : memref<1x128xf32, #tpu.memory_space<vmem>>, vector<1x128xf32>
    %21 = vector.broadcast %20 : vector<1x128xf32> to vector<2x128xf32>
    %22 = arith.addf %19, %21 : vector<2x128xf32>
    %c0_14 = arith.constant 0 : index
    %c0_15 = arith.constant 0 : index
    %23 = vector.load %arg6[%c0_14, %c0_15] : memref<2x128xf32, #tpu.memory_space<vmem>>, vector<2x128xf32>
    tpu.vector_store %arg6[%c0_14, %c0_15], %22 {strides = array<i32>} : memref<2x128xf32, #tpu.memory_space<vmem>>, vector<2x128xf32>,
    return
  }
  func.func @transform_0(%arg0: i32) -> (i32, i32) {
    %c0_i32 = arith.constant 0 : i32
    %c0_i32_0 = arith.constant 0 : i32
    %c0_i32_1 = arith.constant 0 : i32
    return %c0_i32, %c0_i32_0 : i32, i32
  }
  func.func @transform_1(%arg0: i32) -> (i32, i32) {
    %c0_i32 = arith.constant 0 : i32
    %c0_i32_0 = arith.constant 0 : i32
    %c0_i32_1 = arith.constant 0 : i32
    return %c0_i32, %c0_i32_0 : i32, i32
  }
  func.func @transform_2(%arg0: i32) -> (i32, i32) {
    %c0_i32 = arith.constant 0 : i32
    %c0_i32_0 = arith.constant 0 : i32
    %c0_i32_1 = arith.constant 0 : i32
    return %c0_i32, %c0_i32_0 : i32, i32
  }
  func.func @transform_3(%arg0: i32) -> (i32, i32) {
    %c0_i32 = arith.constant 0 : i32
    %c0_i32_0 = arith.constant 0 : i32
    %c0_i32_1 = arith.constant 0 : i32
    return %c0_i32, %c0_i32_0 : i32, i32
  }
  func.func @transform_4(%arg0: i32) -> (i32, i32) {
    %c0_i32 = arith.constant 0 : i32
    %c0_i32_0 = arith.constant 0 : i32
    %c0_i32_1 = arith.constant 0 : i32
    return %c0_i32, %c0_i32_0 : i32, i32
  }
  func.func @transform_5(%arg0: i32) -> (i32, i32) {
    %c0_i32 = arith.constant 0 : i32
    %c0_i32_0 = arith.constant 0 : i32
    %c0_i32_1 = arith.constant 0 : i32
    return %c0_i32, %c0_i32_0 : i32, i32
  }
}

</mosaic_0001>

<bundles_post_ra>
// kernel: forward.1
= control target key start
LH: loop header
LB: loop body
LE: loop exit
PB: predicated region body
PF: predicated region fallthrough
CT: control target
= control target key end

     0   :  { %s1554_s0 = inlined_call_operand.vmem [shape: bf16[512,128], index: 0, kind: input, shape index: {}]   ;;  %s1555_s1 = inlined_call_operand.vmem [shape: bf16[128,128], index: 1, kind: input, shape index: {}]   ;;  %s1556_s2 = inlined_call_operand.vmem [shape: f32[1,128], index: 2, kind: input, shape index: {}]   ;;  %s1557_s3 = inlined_call_operand.vmem [shape: bf16[128,128], index: 3, kind: input, shape index: {}]   ;;  %s1558_s4 = inlined_call_operand.vmem [shape: f32[1,128], index: 4, kind: input, shape index: {}]   ;;  %s1559_s5 = inlined_call_operand.hbm [shape: f32[2,128], index: 5, kind: output, shape index: {}]  }
   0x1   :  { %v1124_v0 = vld [vmem:[%s1555_s1] sm:$0xff]   ;;  %v1125_v1 = vld [vmem:[%s1555_s1 + $0x8] sm:$0xff]   ;;  %v1126_v2 = vld [vmem:[%s1555_s1 + $0x10] sm:$0xff]  }
   0x2   :  { %1005 = vmatprep.subr.bf16.mxu0 %v1124_v0  ;;  %1105 = vmatprep.subr.bf16.mxu1 %v1124_v0  ;;  %v1127_v3 = vld [vmem:[%s1555_s1 + $0x18] sm:$0xff]   ;;  %v1132_v4 = vld [vmem:[%s1554_s0] sm:$0xff]   ;;  %v1129_v6 = vld [vmem:[%s1555_s1 + $0x28] sm:$0xff]  }
   0x3   :  { %1006 = vmatpush3.bf16.msra.mxu0 %v1124_v0  ;;  %1113 = vmatpush3.bf16.msra.mxu1 %v1124_v0  ;;  %v1128_v5 = vld [vmem:[%s1555_s1 + $0x20] sm:$0xff]   ;;  %v1130_v7 = vld [vmem:[%s1555_s1 + $0x30] sm:$0xff]   ;;  %v1131_v8 = vld [vmem:[%s1555_s1 + $0x38] sm:$0xff]  }
   0x4   :  { %1007 = vmatprep.subr.bf16.mxu0 %v1125_v1  ;;  %1106 = vmatprep.subr.bf16.mxu1 %v1125_v1  ;;  %v1150_v9 = vld [vmem:[%s1554_s0 + $0x90] sm:$0xff]   ;;  %v1133_v10 = vld [vmem:[%s1554_s0 + $0x8] sm:$0xff]   ;;  %v1151_v12 = vld [vmem:[%s1554_s0 + $0x98] sm:$0xff]  }
   0x5   :  { %1021 = vmatprep.mubr.bf16.mxu0 %v1132_v4  ;;  %v1134_v11 = vld [vmem:[%s1554_s0 + $0x10] sm:$0xff]   ;;  %1057 = vmatprep.mubr.bf16.mxu1 %v1150_v9  ;;  %v1152_v13 = vld [vmem:[%s1554_s0 + $0xa0] sm:$0xff]   ;;  %v1135_v14 = vld [vmem:[%s1554_s0 + $0x18] sm:$0xff]  }
   0x6   :  { %v1136_v15 = vld [vmem:[%s1554_s0 + $0x20] sm:$0xff]   ;;  %v1153_v16 = vld [vmem:[%s1554_s0 + $0xa8] sm:$0xff]   ;;  %v1154_v17 = vld [vmem:[%s1554_s0 + $0xb0] sm:$0xff]  }
   0x7   :  { %1008 = vmatpush3.bf16.msra.mxu0 %v1125_v1  ;;  %1114 = vmatpush3.bf16.msra.mxu1 %v1125_v1 }
   0x8   :  { %1009 = vmatprep.subr.bf16.mxu0 %v1126_v2  ;;  %1107 = vmatprep.subr.bf16.mxu1 %v1126_v2 }
   0xb   :  { %1010 = vmatpush3.bf16.msra.mxu0 %v1126_v2  ;;  %1115 = vmatpush3.bf16.msra.mxu1 %v1126_v2 }
   0xc   :  { %1011 = vmatprep.subr.bf16.mxu0 %v1127_v3  ;;  %1108 = vmatprep.subr.bf16.mxu1 %v1127_v3 }
   0xf   :  { %1012 = vmatpush3.bf16.msra.mxu0 %v1127_v3  ;;  %1116 = vmatpush3.bf16.msra.mxu1 %v1127_v3 }
  0x10   :  { %1013 = vmatprep.subr.bf16.mxu0 %v1128_v5  ;;  %1109 = vmatprep.subr.bf16.mxu1 %v1128_v5 }
  0x13   :  { %1014 = vmatpush3.bf16.msra.mxu0 %v1128_v5  ;;  %1117 = vmatpush3.bf16.msra.mxu1 %v1128_v5 }
  0x14   :  { %1015 = vmatprep.subr.bf16.mxu0 %v1129_v6  ;;  %1110 = vmatprep.subr.bf16.mxu1 %v1129_v6 }
  0x17   :  { %1016 = vmatpush3.bf16.msra.mxu0 %v1129_v6  ;;  %1118 = vmatpush3.bf16.msra.mxu1 %v1129_v6 }
  0x18   :  { %1017 = vmatprep.subr.bf16.mxu0 %v1130_v7  ;;  %1111 = vmatprep.subr.bf16.mxu1 %v1130_v7 }
  0x1b   :  { %1018 = vmatpush3.bf16.msra.mxu0 %v1130_v7  ;;  %1119 = vmatpush3.bf16.msra.mxu1 %v1130_v7 }
  0x1c   :  { %1019 = vmatprep.subr.bf16.mxu0 %v1131_v8  ;;  %1112 = vmatprep.subr.bf16.mxu1 %v1131_v8 }
  0x1f   :  { %1020 = vmatpush3.bf16.msra.mxu0 %v1131_v8  ;;  %1120 = vmatpush3.bf16.msra.mxu1 %v1131_v8 }
  0x22   :  { %1022 = vmatmul.mubr.bf16.vlgmr.msra.gmra.mrb[0].mxu0 %v1133_v10  ;;  %1058 = vmatmul.mubr.bf16.vlgmr.msra.gmra.mrb[0].mxu1 %v1151_v12 }
  0x23   :  { %1025 = vmatprep.mubr.bf16.mxu0 %v1134_v11  ;;  %1061 = vmatprep.mubr.bf16.mxu1 %v1152_v13 }
  0x2a   :  { %1026 = vmatmul.mubr.bf16.gmra.mrb[4].mxu0 %v1135_v14  ;;  %1062 = vmatmul.mubr.bf16.gmra.mrb[4].mxu1 %v1153_v16 }
  0x2b   :  { %1029 = vmatprep.mubr.bf16.mxu0 %v1136_v15  ;;  %1065 = vmatprep.mubr.bf16.mxu1 %v1154_v17 }
  0x2c   :  { %10 = vsyncpa [#allocation3], 0  ;;  %v1137_v18 = vld [vmem:[%s1554_s0 + $0x28] sm:$0xff]   ;;  %v1155_v19 = vld [vmem:[%s1554_s0 + $0xb8] sm:$0xff]   ;;  %v1196_v41 = vmov 0.0   ;;  %vm1197_vm0 = vmmov 0  }
  0x2d   :  { %v1138_v20 = vld [vmem:[%s1554_s0 + $0x30] sm:$0xff]   ;;  %v1156_v21 = vld [vmem:[%s1554_s0 + $0xc0] sm:$0xff]   ;;  %v1139_v22 = vld [vmem:[%s1554_s0 + $0x38] sm:$0xff]   ;;  %1085 = vmatprep.subr.bf16.mxu1 %v1196_v41  ;;  %vm776_vm1 = vcmask 1040384   ;;  %s1198_s12 = smov [#allocation2]  }
  0x2e   :  { %v1157_v23 = vld [vmem:[%s1554_s0 + $0xc8] sm:$0xff]   ;;  %v1140_v24 = vld [vmem:[%s1554_s0 + $0x40] sm:$0xff]   ;;  %v1158_v25 = vld [vmem:[%s1554_s0 + $0xd0] sm:$0xff]   ;;  %s898_s13 = sshll.u32 %s1198_s12, 4  ;;  %s899_s13 = int_to_ptr.vmem [resolvable:$true] %s898_s13 }
  0x2f   :  { %v1141_v26 = vld [vmem:[%s1554_s0 + $0x48] sm:$0xff]   ;;  %v1159_v27 = vld [vmem:[%s1554_s0 + $0xd8] sm:$0xff]   ;;  %v1142_v28 = vld [vmem:[%s1554_s0 + $0x50] sm:$0xff]   ;;  %s1172_s14 = scalar_lea.vmem %s899_s13, 32  ;;  %p1177_p1 = scmp.lt.s32.totalorder %s899_s13, %s899_s13 }
  0x30   :  { %v1160_v29 = vld [vmem:[%s1554_s0 + $0xe0] sm:$0xff]   ;;  %v1143_v30 = vld [vmem:[%s1554_s0 + $0x58] sm:$0xff]   ;;  %v1161_v31 = vld [vmem:[%s1554_s0 + $0xe8] sm:$0xff]   ;;  %p1173_p0 = scmp.ne.s32.totalorder %s899_s13, %s1172_s14  ;;  %p1178_p2 = scmp.lt.s32.totalorder %s1172_s14, %s1172_s14 }
  0x31   :  { %v1144_v32 = vld [vmem:[%s1554_s0 + $0x60] sm:$0xff]   ;;  %v1162_v33 = vld [vmem:[%s1554_s0 + $0xf0] sm:$0xff]   ;;  %v1145_v34 = vld [vmem:[%s1554_s0 + $0x68] sm:$0xff]  }
  0x32   :  { %1030 = vmatmul.mubr.bf16.gmra.mrb[8].mxu0 %v1137_v18  ;;  %1066 = vmatmul.mubr.bf16.gmra.mrb[8].mxu1 %v1155_v19  ;;  %v1163_v35 = vld [vmem:[%s1554_s0 + $0xf8] sm:$0xff]   ;;  %v1146_v36 = vld [vmem:[%s1554_s0 + $0x70] sm:$0xff]   ;;  %v1148_v38 = vld [vmem:[%s1554_s0 + $0x80] sm:$0xff]   ;;  %p1179_p3 = por %p1178_p2, %p1177_p1 }
  0x33   :  { %1033 = vmatprep.mubr.bf16.mxu0 %v1138_v20  ;;  %1069 = vmatprep.mubr.bf16.mxu1 %v1156_v21  ;;  %v1147_v37 = vld [vmem:[%s1554_s0 + $0x78] sm:$0xff]   ;;  %v1149_v39 = vld [vmem:[%s1554_s0 + $0x88] sm:$0xff]   ;;  %v1164_v40 = vld [vmem:[%s1557_s3] sm:$0xff]  }
  0x34   :  { %1086 = vmatpush3.bf16.msra.mxu1 %v1164_v40  ;;  %v1165_v42 = vld [vmem:[%s1557_s3 + $0x8] sm:$0xff]   ;;  %v1166_v43 = vld [vmem:[%s1557_s3 + $0x10] sm:$0xff]   ;;  %v1167_v44 = vld [vmem:[%s1557_s3 + $0x18] sm:$0xff]   ;;  %p1180_p4 = pnand %p1179_p3, %p1173_p0 }
  0x35   :  { %1087 = vmatprep.subr.bf16.mxu1 %v1196_v41  ;;  %v1369_v45 = vld [vmem:[%s1556_s2] ss:$0 sm:$0xff]  ;;  %v1169_v8 = vld [vmem:[%s1557_s3 + $0x28] sm:$0xff]   ;;  %v1170_v18 = vld [vmem:[%s1557_s3 + $0x30] sm:$0xff]  }
  0x36   :  { %v1168_v60 = vld [vmem:[%s1557_s3 + $0x20] sm:$0xff]  }
  0x38   :  { %1088 = vmatpush3.bf16.msra.mxu1 %v1165_v42 }
  0x39   :  { %1089 = vmatprep.subr.bf16.mxu1 %v1196_v41 }
  0x3a   :  { %1034 = vmatmul.mubr.bf16.gmra.mrb[12].mxu0 %v1139_v22  ;;  %1070 = vmatmul.mubr.bf16.gmra.mrb[12].mxu1 %v1157_v23  ;;  %v1171_v23 = vld [vmem:[%s1557_s3 + $0x38] sm:$0xff]  }
  0x3b   :  { %1037 = vmatprep.mubr.bf16.mxu0 %v1140_v24  ;;  %1073 = vmatprep.mubr.bf16.mxu1 %v1158_v25 }
  0x3c   :  { %1090 = vmatpush3.bf16.msra.mxu1 %v1166_v43 }
  0x3d   :  { %1091 = vmatprep.subr.bf16.mxu1 %v1196_v41 }
  0x40   :  { %1092 = vmatpush3.bf16.msra.mxu1 %v1167_v44 }
  0x41   :  { %1093 = vmatprep.subr.bf16.mxu1 %v1196_v41 }
  0x42   :  { %1038 = vmatmul.mubr.bf16.gmra.mrb[16].mxu0 %v1141_v26  ;;  %1074 = vmatmul.mubr.bf16.gmra.mrb[16].mxu1 %v1159_v27 }
  0x43   :  { %1041 = vmatprep.mubr.bf16.mxu0 %v1142_v28  ;;  %1077 = vmatprep.mubr.bf16.mxu1 %v1160_v29 }
  0x44   :  { %1094 = vmatpush3.bf16.msra.mxu1 %v1168_v60 }
  0x45   :  { %1095 = vmatprep.subr.bf16.mxu1 %v1196_v41 }
  0x48   :  { %1096 = vmatpush3.bf16.msra.mxu1 %v1169_v8 }
  0x49   :  { %1097 = vmatprep.subr.bf16.mxu1 %v1196_v41 }
  0x4a   :  { %1042 = vmatmul.mubr.bf16.gmra.mrb[20].mxu0 %v1143_v30  ;;  %1078 = vmatmul.mubr.bf16.gmra.mrb[20].mxu1 %v1161_v31 }
  0x4b   :  { %1045 = vmatprep.mubr.bf16.mxu0 %v1144_v32  ;;  %1081 = vmatprep.mubr.bf16.mxu1 %v1162_v33 }
  0x4c   :  { %1098 = vmatpush3.bf16.msra.mxu1 %v1170_v18 }
  0x4d   :  { %1099 = vmatprep.subr.bf16.mxu1 %v1196_v41 }
  0x50   :  { %1100 = vmatpush3.bf16.msra.mxu1 %v1171_v23 }
  0x52   :  { %1046 = vmatmul.mubr.bf16.gmra.mrb[24].mxu0 %v1145_v34  ;;  %1082 = vmatmul.mubr.bf16.gmra.mrb[24].mxu1 %v1163_v35 }
  0x53   :  { %1049 = vmatprep.mubr.bf16.mxu0 %v1146_v36  ;;  %1101 = vmatprep.mubr.msk.bf16.mxu1 %vm1197_vm0, %v1196_v41 }
  0x5a   :  { %1050 = vmatmul.mubr.bf16.gmra.mrb[28].mxu0 %v1147_v37 }
  0x5b   :  { %1053 = vmatprep.mubr.bf16.mxu0 %v1148_v38 }
  0x62   :  { %1054 = vmatmul.mubr.bf16.gmra.mrb[32].mxu0 %v1149_v39 }
  0xf5   :  { %v1023_v46 = vpop.f32.mrb[0].mxu0  ;;  %v1371_v47 = vpop.f32.mrb[0].mxu1 }
  0xf6   :  { %v383_v48 = vpop.f32.mrb[1].mxu0  ;;  %v1373_v49 = vpop.f32.mrb[1].mxu1  ;;  %v392_v55 = vadd.f32 %v1023_v46, %v1369_v45 }
  0xf7   :  { %v384_v50 = vadd.f32 %v1369_v45, %v383_v48  ;;  %v1024_v51 = vpop.f32.mrb[2].mxu0  ;;  %v1376_v52 = vpop.f32.mrb[2].mxu1 }
  0xf8   :  { %v386_v53 = vpop.f32.mrb[3].mxu0  ;;  %v1378_v54 = vpop.f32.mrb[3].mxu1  ;;  %v395_v58 = vadd.f32 %v1024_v51, %v1369_v45  ;;  %v640_v61 = vmax.f32 %v392_v55, 0.0 }
  0xf9   :  { %v387_v56 = vadd.f32 %v1369_v45, %v386_v53  ;;  %v638_v57 = vmax.f32 %v384_v50, 0.0 }
  0xfa   :  { %v641_v3 = vmax.f32 %v395_v58, 0.0 }
  0xfb   :  { %v639_v59 = vmax.f32 %v387_v56, 0.0 }
  0xfd   :  { %v702_v62 = vadd.f32 %v639_v59, %v638_v57  ;;  %v1027_v63 = vpop.f32.mrb[4].mxu0  ;;  %v1386_v0 = vpop.f32.mrb[4].mxu1 }
  0xfe   :  { %v399_v1 = vpop.f32.mrb[5].mxu0  ;;  %v1388_v2 = vpop.f32.mrb[5].mxu1  ;;  %v408_v11 = vadd.f32 %v1027_v63, %v1369_v45 }
  0xff   :  { %v703_v4 = vadd.f32 %v702_v62, %v640_v61  ;;  %v400_v5 = vadd.f32 %v1369_v45, %v399_v1  ;;  %v1028_v6 = vpop.f32.mrb[6].mxu0  ;;  %v1392_v7 = vpop.f32.mrb[6].mxu1 }
 0x100   :  { %v402_v9 = vpop.f32.mrb[7].mxu0  ;;  %v1397_v10 = vpop.f32.mrb[7].mxu1  ;;  %v411_v16 = vadd.f32 %v1028_v6, %v1369_v45  ;;  %v644_v19 = vmax.f32 %v408_v11, 0.0 }
 0x101   :  { %v642_v12 = vmax.f32 %v400_v5, 0.0  ;;  %v704_v13 = vadd.f32 %v703_v4, %v641_v3  ;;  %v403_v14 = vadd.f32 %v1369_v45, %v402_v9 }
 0x102   :  { %v645_v26 = vmax.f32 %v411_v16, 0.0 }
 0x103   :  { %v705_v15 = vadd.f32 %v704_v13, %v642_v12  ;;  %v643_v17 = vmax.f32 %v403_v14, 0.0 }
 0x105   :  { %v706_v20 = vadd.f32 %v705_v15, %v643_v17  ;;  %v1031_v21 = vpop.f32.mrb[8].mxu0  ;;  %v1406_v22 = vpop.f32.mrb[8].mxu1 }
 0x106   :  { %v415_v24 = vpop.f32.mrb[9].mxu0  ;;  %v1411_v25 = vpop.f32.mrb[9].mxu1  ;;  %v424_v33 = vadd.f32 %v1031_v21, %v1369_v45 }
 0x107   :  { %v707_v27 = vadd.f32 %v706_v20, %v644_v19  ;;  %v416_v28 = vadd.f32 %v1369_v45, %v415_v24  ;;  %v1032_v29 = vpop.f32.mrb[10].mxu0  ;;  %v1416_v30 = vpop.f32.mrb[10].mxu1 }
 0x108   :  { %v418_v31 = vpop.f32.mrb[11].mxu0  ;;  %v1418_v32 = vpop.f32.mrb[11].mxu1  ;;  %v427_v38 = vadd.f32 %v1032_v29, %v1369_v45  ;;  %v648_v40 = vmax.f32 %v424_v33, 0.0 }
 0x109   :  { %v646_v34 = vmax.f32 %v416_v28, 0.0  ;;  %v708_v35 = vadd.f32 %v707_v27, %v645_v26  ;;  %v419_v36 = vadd.f32 %v1369_v45, %v418_v31 }
 0x10a   :  { %v649_v48 = vmax.f32 %v427_v38, 0.0 }
 0x10b   :  { %v709_v37 = vadd.f32 %v708_v35, %v646_v34  ;;  %v647_v39 = vmax.f32 %v419_v36, 0.0 }
 0x10d   :  { %v710_v41 = vadd.f32 %v709_v37, %v647_v39  ;;  %v1035_v42 = vpop.f32.mrb[12].mxu0  ;;  %v1423_v43 = vpop.f32.mrb[12].mxu1 }
 0x10e   :  { %v431_v44 = vpop.f32.mrb[13].mxu0  ;;  %v1425_v46 = vpop.f32.mrb[13].mxu1  ;;  %v440_v58 = vadd.f32 %v1035_v42, %v1369_v45 }
 0x10f   :  { %v711_v50 = vadd.f32 %v710_v41, %v648_v40  ;;  %v432_v51 = vadd.f32 %v1369_v45, %v431_v44  ;;  %v1036_v53 = vpop.f32.mrb[14].mxu0  ;;  %v1428_v55 = vpop.f32.mrb[14].mxu1 }
 0x110   :  { %v434_v56 = vpop.f32.mrb[15].mxu0  ;;  %v1430_v57 = vpop.f32.mrb[15].mxu1  ;;  %v443_v63 = vadd.f32 %v1036_v53, %v1369_v45  ;;  %v652_v3 = vmax.f32 %v440_v58, 0.0 }
 0x111   :  { %v650_v59 = vmax.f32 %v432_v51, 0.0  ;;  %v712_v60 = vadd.f32 %v711_v50, %v649_v48  ;;  %v435_v61 = vadd.f32 %v1369_v45, %v434_v56 }
 0x112   :  { %v653_v11 = vmax.f32 %v443_v63, 0.0 }
 0x113   :  { %v713_v62 = vadd.f32 %v712_v60, %v650_v59  ;;  %v651_v1 = vmax.f32 %v435_v61, 0.0 }
 0x115   :  { %v714_v4 = vadd.f32 %v713_v62, %v651_v1  ;;  %v1039_v5 = vpop.f32.mrb[16].mxu0  ;;  %v1435_v6 = vpop.f32.mrb[16].mxu1 }
 0x116   :  { %v447_v8 = vpop.f32.mrb[17].mxu0  ;;  %v1437_v9 = vpop.f32.mrb[17].mxu1  ;;  %v456_v18 = vadd.f32 %v1039_v5, %v1369_v45 }
 0x117   :  { %v715_v12 = vadd.f32 %v714_v4, %v652_v3  ;;  %v448_v13 = vadd.f32 %v1369_v45, %v447_v8  ;;  %v1040_v14 = vpop.f32.mrb[18].mxu0  ;;  %v1440_v15 = vpop.f32.mrb[18].mxu1 }
 0x118   :  { %v450_v16 = vpop.f32.mrb[19].mxu0  ;;  %v1442_v17 = vpop.f32.mrb[19].mxu1  ;;  %v459_v24 = vadd.f32 %v1040_v14, %v1369_v45  ;;  %v656_v27 = vmax.f32 %v456_v18, 0.0 }
 0x119   :  { %v654_v19 = vmax.f32 %v448_v13, 0.0  ;;  %v716_v20 = vadd.f32 %v715_v12, %v653_v11  ;;  %v451_v21 = vadd.f32 %v1369_v45, %v450_v16 }
 0x11a   :  { %v657_v35 = vmax.f32 %v459_v24, 0.0 }
 0x11b   :  { %v717_v23 = vadd.f32 %v716_v20, %v654_v19  ;;  %v655_v26 = vmax.f32 %v451_v21, 0.0 }
 0x11d   :  { %v718_v28 = vadd.f32 %v717_v23, %v655_v26  ;;  %v1043_v29 = vpop.f32.mrb[20].mxu0  ;;  %v1447_v31 = vpop.f32.mrb[20].mxu1 }
 0x11e   :  { %v463_v33 = vpop.f32.mrb[21].mxu0  ;;  %v1449_v34 = vpop.f32.mrb[21].mxu1  ;;  %v472_v42 = vadd.f32 %v1043_v29, %v1369_v45 }
 0x11f   :  { %v719_v36 = vadd.f32 %v718_v28, %v656_v27  ;;  %v464_v37 = vadd.f32 %v1369_v45, %v463_v33  ;;  %v1044_v38 = vpop.f32.mrb[22].mxu0  ;;  %v1452_v39 = vpop.f32.mrb[22].mxu1 }
 0x120   :  { %v466_v40 = vpop.f32.mrb[23].mxu0  ;;  %v1454_v41 = vpop.f32.mrb[23].mxu1  ;;  %v475_v53 = vadd.f32 %v1044_v38, %v1369_v45  ;;  %v660_v58 = vmax.f32 %v472_v42, 0.0 }
 0x121   :  { %v658_v44 = vmax.f32 %v464_v37, 0.0  ;;  %v720_v48 = vadd.f32 %v719_v36, %v657_v35  ;;  %v467_v50 = vadd.f32 %v1369_v45, %v466_v40 }
 0x122   :  { %v661_v1 = vmax.f32 %v475_v53, 0.0 }
 0x123   :  { %v721_v51 = vadd.f32 %v720_v48, %v658_v44  ;;  %v659_v56 = vmax.f32 %v467_v50, 0.0 }
 0x125   :  { %v722_v59 = vadd.f32 %v721_v51, %v659_v56  ;;  %v1047_v60 = vpop.f32.mrb[24].mxu0  ;;  %v1459_v61 = vpop.f32.mrb[24].mxu1 }
 0x126   :  { %v479_v62 = vpop.f32.mrb[25].mxu0  ;;  %v1461_v63 = vpop.f32.mrb[25].mxu1  ;;  %v488_v13 = vadd.f32 %v1047_v60, %v1369_v45 }
 0x127   :  { %v723_v3 = vadd.f32 %v722_v59, %v660_v58  ;;  %v480_v4 = vadd.f32 %v1369_v45, %v479_v62  ;;  %v1048_v5 = vpop.f32.mrb[26].mxu0  ;;  %v1464_v8 = vpop.f32.mrb[26].mxu1 }
 0x128   :  { %v482_v11 = vpop.f32.mrb[27].mxu0  ;;  %v1466_v12 = vpop.f32.mrb[27].mxu1  ;;  %v491_v20 = vadd.f32 %v1048_v5, %v1369_v45  ;;  %v664_v23 = vmax.f32 %v488_v13, 0.0 }
 0x129   :  { %v662_v14 = vmax.f32 %v480_v4, 0.0  ;;  %v724_v16 = vadd.f32 %v723_v3, %v661_v1  ;;  %v483_v18 = vadd.f32 %v1369_v45, %v482_v11 }
 0x12a   :  { %v665_v28 = vmax.f32 %v491_v20, 0.0 }
 0x12b   :  { %v725_v19 = vadd.f32 %v724_v16, %v662_v14  ;;  %v663_v21 = vmax.f32 %v483_v18, 0.0  ;;  %v528_v18 = vadd.f32 %v1369_v45, %v1373_v49  ;;  %v544_v49 = vadd.f32 %v1369_v45, %v1388_v2 }
 0x12c   :  { %v560_v2 = vadd.f32 %v1369_v45, %v1411_v25  ;;  %v576_v25 = vadd.f32 %v1369_v45, %v1425_v46  ;;  %v592_v46 = vadd.f32 %v1369_v45, %v1437_v9  ;;  %v608_v9 = vadd.f32 %v1369_v45, %v1449_v34 }
 0x12d   :  { %v726_v24 = vadd.f32 %v725_v19, %v663_v21  ;;  %v1051_v26 = vpop.f32.mrb[28].mxu0  ;;  %v624_v34 = vadd.f32 %v1369_v45, %v1461_v63 }
 0x12e   :  { %v495_v27 = vpop.f32.mrb[29].mxu0  ;;  %v504_v37 = vadd.f32 %v1051_v26, %v1369_v45  ;;  %v531_v26 = vadd.f32 %v1369_v45, %v1378_v54  ;;  %v547_v54 = vadd.f32 %v1369_v45, %v1397_v10  ;;  %v563_v10 = vadd.f32 %v1369_v45, %v1418_v32 }
 0x12f   :  { %v727_v29 = vadd.f32 %v726_v24, %v664_v23  ;;  %v496_v33 = vadd.f32 %v1369_v45, %v495_v27  ;;  %v1052_v35 = vpop.f32.mrb[30].mxu0  ;;  %v674_v24 = vmax.f32 %v528_v18, 0.0  ;;  %v536_v27 = vadd.f32 %v1371_v47, %v1369_v45 }
 0x130   :  { %v498_v36 = vpop.f32.mrb[31].mxu0  ;;  %v507_v48 = vadd.f32 %v1052_v35, %v1369_v45  ;;  %v668_v51 = vmax.f32 %v504_v37, 0.0  ;;  %v675_v35 = vmax.f32 %v531_v26, 0.0  ;;  %v552_v47 = vadd.f32 %v1386_v0, %v1369_v45 }
 0x131   :  { %v666_v38 = vmax.f32 %v496_v33, 0.0  ;;  %v728_v40 = vadd.f32 %v727_v29, %v665_v28  ;;  %v499_v42 = vadd.f32 %v1369_v45, %v498_v36  ;;  %v539_v33 = vadd.f32 %v1376_v52, %v1369_v45 }
 0x132   :  { %v669_v59 = vmax.f32 %v507_v48, 0.0  ;;  %v676_v36 = vmax.f32 %v536_v27, 0.0  ;;  %v555_v52 = vadd.f32 %v1392_v7, %v1369_v45  ;;  %v568_v0 = vadd.f32 %v1406_v22, %v1369_v45 }
 0x133   :  { %v729_v44 = vadd.f32 %v728_v40, %v666_v38  ;;  %v667_v50 = vmax.f32 %v499_v42, 0.0  ;;  %v677_v38 = vmax.f32 %v539_v33, 0.0  ;;  %v678_v42 = vmax.f32 %v544_v49, 0.0 }
 0x134   :  { %v571_v7 = vadd.f32 %v1416_v30, %v1369_v45  ;;  %v579_v32 = vadd.f32 %v1369_v45, %v1430_v57  ;;  %v584_v22 = vadd.f32 %v1423_v43, %v1369_v45  ;;  %v587_v30 = vadd.f32 %v1428_v55, %v1369_v45 }
 0x135   :  { %v730_v53 = vadd.f32 %v729_v44, %v667_v50  ;;  %v1055_v56 = vpop.f32.mrb[32].mxu0  ;;  %v679_v50 = vmax.f32 %v547_v54, 0.0  ;;  %v690_v26 = vmax.f32 %v592_v46, 0.0  ;;  %v595_v57 = vadd.f32 %v1369_v45, %v1442_v17 }
 0x136   :  { %v511_v58 = vpop.f32.mrb[33].mxu0  ;;  %v520_v5 = vadd.f32 %v1055_v56, %v1369_v45  ;;  %v681_v56 = vmax.f32 %v555_v52, 0.0  ;;  %v600_v43 = vadd.f32 %v1435_v6, %v1369_v45  ;;  %v603_v55 = vadd.f32 %v1440_v15, %v1369_v45 }
 0x137   :  { %v731_v60 = vadd.f32 %v730_v53, %v668_v51  ;;  %v512_v62 = vadd.f32 %v1369_v45, %v511_v58  ;;  %v1056_v1 = vpop.f32.mrb[34].mxu0  ;;  %v680_v51 = vmax.f32 %v552_v47, 0.0  ;;  %v611_v17 = vadd.f32 %v1369_v45, %v1454_v41 }
 0x138   :  { %v514_v3 = vpop.f32.mrb[35].mxu0  ;;  %v523_v14 = vadd.f32 %v1056_v1, %v1369_v45  ;;  %v672_v19 = vmax.f32 %v520_v5, 0.0  ;;  %v683_v1 = vmax.f32 %v563_v10, 0.0  ;;  %v692_v33 = vmax.f32 %v600_v43, 0.0 }
 0x139   :  { %v1476_v4 = vadd.f32 %v731_v60, %v669_v59  ;;  %v515_v11 = vadd.f32 %v1369_v45, %v514_v3  ;;  %v670_v13 = vmax.f32 %v512_v62, 0.0  ;;  %v682_v59 = vmax.f32 %v560_v2, 0.0 }
 0x13a   :  { %v673_v21 = vmax.f32 %v523_v14, 0.0  ;;  %v684_v3 = vmax.f32 %v568_v0, 0.0  ;;  %v686_v14 = vmax.f32 %v576_v25, 0.0  ;;  %v693_v49 = vmax.f32 %v603_v55, 0.0 }
 0x13b   :  { %v671_v16 = vmax.f32 %v515_v11, 0.0  ;;  %v685_v11 = vmax.f32 %v571_v7, 0.0  ;;  %v616_v6 = vadd.f32 %v1447_v31, %v1369_v45  ;;  %v619_v15 = vadd.f32 %v1452_v39, %v1369_v45 }
 0x13c   :  { %v698_v52 = vmax.f32 %v624_v34, 0.0  ;;  %v627_v41 = vadd.f32 %v1369_v45, %v1466_v12  ;;  %v632_v31 = vadd.f32 %v1459_v61, %v1369_v45  ;;  %v635_v39 = vadd.f32 %v1464_v8, %v1369_v45 }
 0x13d   :  { %v739_v20 = vadd.f32 %v671_v16, %v670_v13  ;;  %v696_v54 = vmax.f32 %v616_v6, 0.0 }
 0x13f   :  { %v740_v23 = vadd.f32 %v739_v20, %v672_v19  ;;  %v687_v19 = vmax.f32 %v579_v32, 0.0  ;;  %v688_v20 = vmax.f32 %v584_v22, 0.0 }
 0x141   :  { %v741_v28 = vadd.f32 %v740_v23, %v673_v21  ;;  %v689_v23 = vmax.f32 %v587_v30, 0.0 }
 0x143   :  { %v742_v29 = vadd.f32 %v741_v28, %v674_v24 }
 0x145   :  { %v743_v37 = vadd.f32 %v742_v29, %v675_v35  ;;  %v691_v29 = vmax.f32 %v595_v57, 0.0 }
 0x147   :  { %v744_v40 = vadd.f32 %v743_v37, %v676_v36  ;;  %v694_v37 = vmax.f32 %v608_v9, 0.0 }
 0x149   :  { %v745_v44 = vadd.f32 %v744_v40, %v677_v38 }
 0x14b   :  { %v746_v48 = vadd.f32 %v745_v44, %v678_v42  ;;  %v695_v42 = vmax.f32 %v611_v17, 0.0  ;;  %v697_v44 = vmax.f32 %v619_v15, 0.0 }
 0x14d   :  { %v747_v53 = vadd.f32 %v746_v48, %v679_v50  ;;  %v733_v50 = vrot.slane %v1476_v4, 4 }
 0x14f   :  { %v748_v58 = vadd.f32 %v747_v53, %v680_v51  ;;  %v699_v53 = vmax.f32 %v627_v41, 0.0  ;;  %v734_v63 = vadd.f32 %v733_v50, %v1476_v4  ;;  %v947_v4 = vld [vmem:[%s1558_s4] ss:$0 sm:$0xff] }
 0x151   :  { %v749_v60 = vadd.f32 %v748_v58, %v681_v56  ;;  %v700_v56 = vmax.f32 %v632_v31, 0.0  ;;  %v735_v0 = vrot.slane %v734_v63, 2 }
 0x153   :  { %v750_v62 = vadd.f32 %v749_v60, %v682_v59  ;;  %v701_v59 = vmax.f32 %v635_v39, 0.0 }
 0x155   :  { %v751_v5 = vadd.f32 %v750_v62, %v683_v1  ;;  %v736_v62 = vadd.f32 %v735_v0, %v734_v63 }
 0x157   :  { %v752_v13 = vadd.f32 %v751_v5, %v684_v3  ;;  %v737_v25 = vrot.slane %v736_v62, 1 }
 0x159   :  { %v753_v16 = vadd.f32 %v752_v13, %v685_v11  ;;  %v738_v5 = vadd.f32 %v737_v25, %v736_v62 }
 0x15b   :  { %v754_v18 = vadd.f32 %v753_v16, %v686_v14 }
 0x15d   :  { %v755_v21 = vadd.f32 %v754_v18, %v687_v19 }
 0x15f   :  { %v756_v24 = vadd.f32 %v755_v21, %v688_v20 }
 0x161   :  { %v757_v27 = vadd.f32 %v756_v24, %v689_v23 }
 0x163   :  { %v758_v28 = vadd.f32 %v757_v27, %v690_v26 }
 0x165   :  { %v759_v35 = vadd.f32 %v758_v28, %v691_v29 }
 0x167   :  { %v760_v36 = vadd.f32 %v759_v35, %v692_v33 }
 0x169   :  { %v761_v38 = vadd.f32 %v760_v36, %v693_v49 }
 0x16b   :  { %v762_v40 = vadd.f32 %v761_v38, %v694_v37 }
 0x16d   :  { %v763_v47 = vadd.f32 %v762_v40, %v695_v42 }
 0x16f   :  { %v764_v48 = vadd.f32 %v763_v47, %v696_v54 }
 0x171   :  { %v765_v2 = vadd.f32 %v764_v48, %v697_v44 }
 0x173   :  { %v766_v51 = vadd.f32 %v765_v2, %v698_v52 }
 0x175   :  { %v767_v58 = vadd.f32 %v766_v51, %v699_v53 }
 0x177   :  { %v768_v10 = vadd.f32 %v767_v58, %v700_v56 }
 0x179   :  { %v769_v60 = vadd.f32 %v768_v10, %v701_v59 }
 0x17b   :  { %v770_v12 = vrot.slane %v769_v60, 4 }
 0x17d   :  { %v771_v7 = vadd.f32 %v770_v12, %v769_v60 }
 0x17f   :  { %v772_v1 = vrot.slane %v771_v7, 2 }
 0x181   :  { %v773_v61 = vadd.f32 %v772_v1, %v771_v7 }
 0x183   :  { %v774_v3 = vrot.slane %v773_v61, 1 }
 0x185   :  { %v775_v11 = vadd.f32 %v774_v3, %v773_v61 }
 0x187   :  { %v777_v45 = vsel %vm776_vm1, %v738_v5, %v775_v11 }
 0x188   :  { %v778_v8 = vmul.f32 0.00390625, %v777_v45 }
 0x18a   :  { %v779_v13 = vpack.c.bf16 %v778_v8, %v778_v8 }
 0x18c   :  { %1102 = vmatmul.mubr.bf16.vlgmr.msra.gmra.mrb[28].mxu1 %v779_v13 }
 0x25f   :  { %v885_v14 = vpop.f32.mrb[28].mxu1 }
 0x260   :  { %v886_v32 = vadd.f32 %v947_v4, %v885_v14  ;;  %v1103_v22 = vpop.f32.mrb[29].mxu1 }
 0x261   :  { %v888_v16 = vpop.f32.mrb[30].mxu1 }
 0x262   :  { %891 = vst [vmem:[#allocation2] sm:$0x3] %v886_v32  ;;  %v1104_v18 = vpop.f32.mrb[31].mxu1 }
 0x263   :  { %1183 = shalt.err (!%p1180_p4)
}
 0x264   :  { %s1184_s4 = scalar_lea.hbm %s1559_s5, 32 }
 0x265   :  { %p1185_p5 = scmp.ne.s32.totalorder %s1559_s5, %s1184_s4  ;;  %p1188_p6 = scmp.lt.u32.totalorder %s1184_s4, %s1559_s5 }
 0x267   :  { %p1190_p7 = pnand %p1188_p6, %p1185_p5 }
 0x269   :  { %1193 = shalt.err (!%p1190_p7)
}
 0x26a   :  { %901 = dma.vmem_to_hbm [thread:$0]  %s899_s13, 32, %s1559_s5, [#allocation3]  }
 0x26b   :  { %1194 = dma.done.wait [#allocation3], 32  }
 0x26c   :  { %1195 = vsyncadd [#allocation3], 4294967264 }
 0x26d   :  { %905 = vsyncpa [#allocation3], 1 }

</bundles_post_ra>
